<compile_context>
chip_gen: v7x
topology: tpu7x:2x2x1
jax: 0.10.0
libtpu: 0.0.40
codegen_flags: <defaults>
</compile_context>

<pallas_src>
import numpy as np
import jax
import jax.numpy as jnp
from jax import lax
from jax.experimental import pallas as pl
from jax.experimental.pallas import tpu as pltpu

EPS = 1e-5


def _round_up(x, m):
    return (x + m - 1) // m * m


def resblock_pallas(x_ncl, params, *, l_tile=None, use_bf16_matmul=False):
    """ResBlock forward.  x_ncl: (N, Cin, L) f32 (PyTorch Conv1d layout).
    Returns (N, Cout, L) with Cout = params['w1'].shape[0]."""
    N, Cin, L = x_ncl.shape
    Cout, _, K = params["w1"].shape
    assert K == 3, "kernel specialized for kernel_size=3 / padding=1 / stride=1"

    f32 = jnp.float32
    Cp = _round_up(Cout, 128)                      # lane-dense padded channel count
    TL = l_tile if l_tile is not None else min(512, _round_up(L, 8))
    TL = _round_up(TL, 8)                          # output rows per tile (sublane-aligned)
    nT = -(-L // TL)                               # ceil(L / TL)
    Lp = nT * TL
    TLH = TL + 4                                   # +-2 input-row halo for 2 stacked K=3 convs

    # ---- fold conv bias + BN running stats into per-channel scale/shift ----
    def fold_bn(bias, g, beta, rm, rv):
        s = g / jnp.sqrt(rv + EPS)
        return s, (bias - rm) * s + beta

    s1, t1 = fold_bn(params["b1"], params["g1"], params["beta1"], params["rm1"], params["rv1"])
    s2, t2 = fold_bn(params["b2"], params["g2"], params["beta2"], params["rm2"], params["rv2"])
    sr, tr = fold_bn(params["br"], params["gr"], params["betar"], params["rmr"], params["rvr"])

    def pad_c(v):
        return jnp.pad(v.astype(f32), (0, Cp - Cout))

    # rows: [s1, t1, s2, t2, sr, tr, prelu_a1, prelu_a2]
    pmat = jnp.stack([
        pad_c(s1), pad_c(t1), pad_c(s2), pad_c(t2), pad_c(sr), pad_c(tr),
        jnp.full((Cp,), params["a1"], dtype=f32),
        jnp.full((Cp,), params["a2"], dtype=f32),
    ], axis=0)                                     # (8, Cp)

    # ---- weights: torch (Cout, Cin, K) -> im2col (K*Cin_p, Cp), channel-padded ----
    def im2col_w(w, cin_pad=None):
        co, ci, k = w.shape
        w = jnp.transpose(w.astype(f32), (2, 1, 0))            # (K, Ci, Co)
        if cin_pad is not None and cin_pad != ci:
            w = jnp.pad(w, ((0, 0), (0, cin_pad - ci), (0, 0)))
        w = jnp.pad(w, ((0, 0), (0, 0), (0, Cp - co)))
        return w.reshape(k * w.shape[1], Cp)

    w1r = jnp.concatenate([im2col_w(params["w1"]), im2col_w(params["wr"])], axis=1)  # (3*Cin, 2*Cp)
    w2c = im2col_w(params["w2"], cin_pad=Cp)                                         # (3*Cp,  Cp)

    # ---- input: (N, Cin, L) -> channels-last overlapping L-tiles with 2-row halo ----
    x_nlc = jnp.transpose(x_ncl, (0, 2, 1)).astype(f32)            # (N, L, Cin)
    xp = jnp.pad(x_nlc, ((0, 0), (2, (Lp - L) + 2), (0, 0)))       # (N, Lp+4, Cin)
    xwin = jnp.stack([xp[:, t * TL:t * TL + TLH, :] for t in range(nT)], axis=1)     # (N,nT,TLH,Cin)

    def kernel(xw_ref, w1r_ref, w2_ref, p_ref, o_ref):
        t = pl.program_id(1)
        xw = xw_ref[0, 0]                                          # (TLH, Cin)

        # conv1 + residual conv: one fused im2col matmul (contraction = 3*Cin).
        a1 = jnp.concatenate([xw[0:TL + 2], xw[1:TL + 3], xw[2:TL + 4]], axis=1)     # (TL+2, 3*Cin)
        w1 = w1r_ref[...]
        if use_bf16_matmul:
            a1, w1 = a1.astype(jnp.bfloat16), w1.astype(jnp.bfloat16)
        y = jnp.dot(a1, w1, preferred_element_type=f32)            # (TL+2, 2*Cp)
        y1, yr = y[:, :Cp], y[:, Cp:]                              # 128-aligned lane split

        # BN1 + PReLU1 (computed with +-1 halo row so conv2 needs no cross-tile data).
        x1 = y1 * p_ref[0:1, :] + p_ref[1:2, :]
        x1 = jnp.where(x1 >= 0.0, x1, x1 * p_ref[6:7, :])
        # conv2's padding=1 uses literal zeros outside [0, L): zero out-of-range halo rows.
        q = lax.broadcasted_iota(jnp.int32, (TL + 2, 1), 0)
        pos = t * TL - 1 + q
        x1 = jnp.where((pos >= 0) & (pos < L), x1, 0.0)

        # conv2: one im2col matmul (contraction = 3*Cp) + BN2 + PReLU2.
        a2 = jnp.concatenate([x1[0:TL], x1[1:TL + 1], x1[2:TL + 2]], axis=1)         # (TL, 3*Cp)
        w2 = w2_ref[...]
        if use_bf16_matmul:
            a2, w2 = a2.astype(jnp.bfloat16), w2.astype(jnp.bfloat16)
        y2 = jnp.dot(a2, w2, preferred_element_type=f32)           # (TL, Cp)
        x2 = y2 * p_ref[2:3, :] + p_ref[3:4, :]
        x2 = jnp.where(x2 >= 0.0, x2, x2 * p_ref[7:8, :])

        # residual BN + skip add; lane-dense store.
        xr = yr[1:TL + 1] * p_ref[4:5, :] + p_ref[5:6, :]
        o_ref[0] = (x2 + xr).astype(o_ref.dtype)

    out = pl.pallas_call(
        kernel,
        out_shape=jax.ShapeDtypeStruct((N, Lp, Cp), f32),
        grid=(N, nT),
        in_specs=[
            pl.BlockSpec((1, 1, TLH, Cin), lambda n, t: (n, t, 0, 0)),   # overlapping L-tiles
            pl.BlockSpec((3 * Cin, 2 * Cp), lambda n, t: (0, 0)),        # fused conv1+res weights
            pl.BlockSpec((3 * Cp, Cp), lambda n, t: (0, 0)),             # conv2 weights
            pl.BlockSpec((8, Cp), lambda n, t: (0, 0)),                  # BN affines + PReLU slopes
        ],
        out_specs=pl.BlockSpec((1, TL, Cp), lambda n, t: (n, t, 0)),
        compiler_params=pltpu.CompilerParams(
            dimension_semantics=("parallel", "parallel"),
            vmem_limit_bytes=48 * 1024 * 1024,
        ),
    )(xwin, w1r, w2c, pmat)

    return jnp.transpose(out[:, :L, :Cout], (0, 2, 1))                   # back to (N, Cout, L)


# ----------------------------- pure-JAX reference -----------------------------
def _ref_conv1d(x, w, b, padding=1):
    y = lax.conv_general_dilated(
        x, w, window_strides=(1,), padding=((padding, padding),),
        dimension_numbers=("NCH", "OIH", "NCH"))
    return y + b[None, :, None]


def _ref_bn(y, g, b, rm, rv):
    return (y - rm[None, :, None]) / jnp.sqrt(rv[None, :, None] + EPS) * \
        g[None, :, None] + b[None, :, None]


def _ref_prelu(y, a):
    return jnp.where(y >= 0, y, a * y)


def resblock_ref(x, p):
    x1 = _ref_prelu(_ref_bn(_ref_conv1d(x, p["w1"], p["b1"]),
                            p["g1"], p["beta1"], p["rm1"], p["rv1"]), p["a1"])
    x2 = _ref_prelu(_ref_bn(_ref_conv1d(x1, p["w2"], p["b2"]),
                            p["g2"], p["beta2"], p["rm2"], p["rv2"]), p["a2"])
    xr = _ref_bn(_ref_conv1d(x, p["wr"], p["br"]),
                 p["gr"], p["betar"], p["rmr"], p["rvr"])
    return xr + x2


# ------------------------------------ main ------------------------------------
if __name__ == "__main__":
    N, C, L = 2, 4, 16
    factor = 2
    Cout = C * factor
    K = 3
    # skip_kernel_size = (stride+1)*K - stride - 2*padding*stride = 3 for stride=1, pad=1

    key = jax.random.PRNGKey(0)
    ks = jax.random.split(key, 20)

    def rnd(k, shape, scale=0.1):
        return scale * jax.random.normal(k, shape, dtype=jnp.float32)

    params = {
        # conv1 / bn1 / prelu1
        "w1": rnd(ks[0], (Cout, C, K)), "b1": rnd(ks[1], (Cout,)),
        "g1": 1.0 + rnd(ks[2], (Cout,)), "beta1": rnd(ks[3], (Cout,)),
        "rm1": rnd(ks[4], (Cout,)),
        "rv1": jax.random.uniform(ks[5], (Cout,), jnp.float32, 0.5, 1.5),
        "a1": jnp.float32(0.25),
        # conv2 / bn2 / prelu2
        "w2": rnd(ks[6], (Cout, Cout, K)), "b2": rnd(ks[7], (Cout,)),
        "g2": 1.0 + rnd(ks[8], (Cout,)), "beta2": rnd(ks[9], (Cout,)),
        "rm2": rnd(ks[10], (Cout,)),
        "rv2": jax.random.uniform(ks[11], (Cout,), jnp.float32, 0.5, 1.5),
        "a2": jnp.float32(0.25),
        # residual conv / bn
        "wr": rnd(ks[12], (Cout, C, K)), "br": rnd(ks[13], (Cout,)),
        "gr": 1.0 + rnd(ks[14], (Cout,)), "betar": rnd(ks[15], (Cout,)),
        "rmr": rnd(ks[16], (Cout,)),
        "rvr": jax.random.uniform(ks[17], (Cout,), jnp.float32, 0.5, 1.5),
    }

    x = jax.random.normal(ks[18], (N, C, L), dtype=jnp.float32)

    ref = jax.block_until_ready(resblock_ref(x, params))

    # multi-tile path (L tiled into 2 halo'd tiles) and single-tile path
    out_tiled = jax.block_until_ready(resblock_pallas(x, params, l_tile=8))
    out_full = jax.block_until_ready(resblock_pallas(x, params))

    for name, out in (("tiled", out_tiled), ("full", out_full)):
        if not np.allclose(np.asarray(out), np.asarray(ref), rtol=1e-4, atol=1e-4):
            raise AssertionError(f"Pallas ResBlock ({name}) output mismatch vs JAX reference")

    print("KERNEL_OK")
</pallas_src>

<mosaic_0001>
module attributes {stable_mosaic.version = 11 : i64} {
  func.func @kernel(%arg0: i32, %arg1: i32, %arg2: memref<1x1x12x4xf32, #tpu.memory_space<vmem>>, %arg3: memref<12x256xf32, #tpu.memory_space<vmem>>, %arg4: memref<384x128xf32, #tpu.memory_space<vmem>>, %arg5: memref<8x128xf32, #tpu.memory_space<vmem>>, %arg6: memref<1x8x128xf32, #tpu.memory_space<vmem>>) attributes {dimension_semantics = [#tpu.dimension_semantics<parallel>, #tpu.dimension_semantics<parallel>], iteration_bounds = array<i64: 2, 2>, scalar_prefetch = 0 : i64, scratch_operands = 0 : i64, tpu.core_type = #tpu.core_type<tc>, window_params = [{transform_indices = @transform_0, window_bounds = array<i64: 1, 1, 12, 4>}, {pipeline_mode = #tpu.pipeline_mode<synchronous>, transform_indices = @transform_1, window_bounds = array<i64: 12, 256>}, {pipeline_mode = #tpu.pipeline_mode<synchronous>, transform_indices = @transform_2, window_bounds = array<i64: 384, 128>}, {pipeline_mode = #tpu.pipeline_mode<synchronous>, transform_indices = @transform_3, window_bounds = array<i64: 8, 128>}, {transform_indices = @transform_4, window_bounds = array<i64: 1, 8, 128>}]} {
    %c0 = arith.constant 0 : index
    %c0_0 = arith.constant 0 : index
    %c0_1 = arith.constant 0 : index
    %c0_2 = arith.constant 0 : index
    %0 = vector.load %arg2[%c0, %c0_0, %c0_1, %c0_2] : memref<1x1x12x4xf32, #tpu.memory_space<vmem>>, vector<1x1x12x4xf32>
    %1 = vector.shape_cast %0 : vector<1x1x12x4xf32> to vector<12x4xf32>
    %2 = vector.extract_strided_slice %1 {offsets = [0, 0], sizes = [10, 4], strides = [1, 1]} : vector<12x4xf32> to vector<10x4xf32>
    %3 = vector.extract_strided_slice %1 {offsets = [1, 0], sizes = [10, 4], strides = [1, 1]} : vector<12x4xf32> to vector<10x4xf32>
    %4 = vector.extract_strided_slice %1 {offsets = [2, 0], sizes = [10, 4], strides = [1, 1]} : vector<12x4xf32> to vector<10x4xf32>
    %5 = tpu.concatenate %2, %3, %4 in 1 : vector<10x4xf32>, vector<10x4xf32>, vector<10x4xf32> -> vector<10x12xf32>
    %c0_3 = arith.constant 0 : index
    %c0_4 = arith.constant 0 : index
    %6 = vector.load %arg3[%c0_3, %c0_4] : memref<12x256xf32, #tpu.memory_space<vmem>>, vector<12x256xf32>
    %cst = arith.constant dense<0.000000e+00> : vector<10x256xf32>
    %7 = tpu.matmul %5, %6, %cst {dimension_numbers = #tpu.dot_dimension_numbers<[1], [0], [0], [1], [0, 0, 1, 1], [], []>} : vector<10x12xf32>, vector<12x256xf32>, vector<10x256xf32> -> vector<10x256xf32>
    %8 = vector.extract_strided_slice %7 {offsets = [0, 0], sizes = [10, 128], strides = [1, 1]} : vector<10x256xf32> to vector<10x128xf32>
    %9 = vector.extract_strided_slice %7 {offsets = [0, 128], sizes = [10, 128], strides = [1, 1]} : vector<10x256xf32> to vector<10x128xf32>
    %c0_5 = arith.constant 0 : index
    %c0_6 = arith.constant 0 : index
    %10 = vector.load %arg5[%c0_5, %c0_6] : memref<8x128xf32, #tpu.memory_space<vmem>>, vector<1x128xf32>
    %11 = vector.broadcast %10 : vector<1x128xf32> to vector<10x128xf32>
    %12 = arith.mulf %8, %11 : vector<10x128xf32>
    %c1 = arith.constant 1 : index
    %c0_7 = arith.constant 0 : index
    %13 = vector.load %arg5[%c1, %c0_7] : memref<8x128xf32, #tpu.memory_space<vmem>>, vector<1x128xf32>
    %14 = vector.broadcast %13 : vector<1x128xf32> to vector<10x128xf32>
    %15 = arith.addf %12, %14 : vector<10x128xf32>
    %cst_8 = arith.constant 0.000000e+00 : f32
    %16 = vector.broadcast %cst_8 : f32 to vector<10x128xf32>
    %17 = arith.cmpf oge, %15, %16 : vector<10x128xf32>
    %c6 = arith.constant 6 : index
    %c0_9 = arith.constant 0 : index
    %18 = vector.load %arg5[%c6, %c0_9] : memref<8x128xf32, #tpu.memory_space<vmem>>, vector<1x128xf32>
    %19 = vector.broadcast %18 : vector<1x128xf32> to vector<10x128xf32>
    %20 = arith.mulf %15, %19 : vector<10x128xf32>
    %21 = arith.select %17, %15, %20 : vector<10x128xi1>, vector<10x128xf32>
    %22 = tpu.iota {dimensions = array<i32: 0>} : vector<10x1xi32>
    %c8_i32 = arith.constant 8 : i32
    %23 = arith.muli %arg1, %c8_i32 : i32
    %c1_i32 = arith.constant 1 : i32
    %24 = arith.subi %23, %c1_i32 : i32
    %25 = vector.broadcast %24 : i32 to vector<10x1xi32>
    %26 = arith.addi %25, %22 : vector<10x1xi32>
    %c0_i32 = arith.constant 0 : i32
    %27 = vector.broadcast %c0_i32 : i32 to vector<10x1xi32>
    %28 = arith.cmpi sge, %26, %27 : vector<10x1xi32>
    %c16_i32 = arith.constant 16 : i32
    %29 = vector.broadcast %c16_i32 : i32 to vector<10x1xi32>
    %30 = arith.cmpi slt, %26, %29 : vector<10x1xi32>
    %31 = arith.andi %28, %30 : vector<10x1xi1>
    %cst_10 = arith.constant 0.000000e+00 : f32
    %32 = vector.shape_cast %31 : vector<10x1xi1> to vector<10x1xi1>
    %33 = vector.broadcast %32 : vector<10x1xi1> to vector<10x128xi1>
    %34 = vector.broadcast %cst_10 : f32 to vector<10x128xf32>
    %35 = arith.select %33, %21, %34 : vector<10x128xi1>, vector<10x128xf32>
    %36 = vector.extract_strided_slice %35 {offsets = [0, 0], sizes = [8, 128], strides = [1, 1]} : vector<10x128xf32> to vector<8x128xf32>
    %37 = vector.extract_strided_slice %35 {offsets = [1, 0], sizes = [8, 128], strides = [1, 1]} : vector<10x128xf32> to vector<8x128xf32>
    %38 = vector.extract_strided_slice %35 {offsets = [2, 0], sizes = [8, 128], strides = [1, 1]} : vector<10x128xf32> to vector<8x128xf32>
    %39 = tpu.concatenate %36, %37, %38 in 1 : vector<8x128xf32>, vector<8x128xf32>, vector<8x128xf32> -> vector<8x384xf32>
    %c0_11 = arith.constant 0 : index
    %c0_12 = arith.constant 0 : index
    %40 = vector.load %arg4[%c0_11, %c0_12] : memref<384x128xf32, #tpu.memory_space<vmem>>, vector<384x128xf32>
    %cst_13 = arith.constant dense<0.000000e+00> : vector<8x128xf32>
    %41 = tpu.matmul %39, %40, %cst_13 {dimension_numbers = #tpu.dot_dimension_numbers<[1], [0], [0], [1], [0, 0, 1, 1], [], []>} : vector<8x384xf32>, vector<384x128xf32>, vector<8x128xf32> -> vector<8x128xf32>
    %c2 = arith.constant 2 : index
    %c0_14 = arith.constant 0 : index
    %42 = vector.load %arg5[%c2, %c0_14] : memref<8x128xf32, #tpu.memory_space<vmem>>, vector<1x128xf32>
    %43 = vector.broadcast %42 : vector<1x128xf32> to vector<8x128xf32>
    %44 = arith.mulf %41, %43 : vector<8x128xf32>
    %c3 = arith.constant 3 : index
    %c0_15 = arith.constant 0 : index
    %45 = vector.load %arg5[%c3, %c0_15] : memref<8x128xf32, #tpu.memory_space<vmem>>, vector<1x128xf32>
    %46 = vector.broadcast %45 : vector<1x128xf32> to vector<8x128xf32>
    %47 = arith.addf %44, %46 : vector<8x128xf32>
    %cst_16 = arith.constant 0.000000e+00 : f32
    %48 = vector.broadcast %cst_16 : f32 to vector<8x128xf32>
    %49 = arith.cmpf oge, %47, %48 : vector<8x128xf32>
    %c7 = arith.constant 7 : index
    %c0_17 = arith.constant 0 : index
    %50 = vector.load %arg5[%c7, %c0_17] : memref<8x128xf32, #tpu.memory_space<vmem>>, vector<1x128xf32>
    %51 = vector.broadcast %50 : vector<1x128xf32> to vector<8x128xf32>
    %52 = arith.mulf %47, %51 : vector<8x128xf32>
    %53 = arith.select %49, %47, %52 : vector<8x128xi1>, vector<8x128xf32>
    %54 = vector.extract_strided_slice %9 {offsets = [1, 0], sizes = [8, 128], strides = [1, 1]} : vector<10x128xf32> to vector<8x128xf32>
    %c4 = arith.constant 4 : index
    %c0_18 = arith.constant 0 : index
    %55 = vector.load %arg5[%c4, %c0_18] : memref<8x128xf32, #tpu.memory_space<vmem>>, vector<1x128xf32>
    %56 = vector.broadcast %55 : vector<1x128xf32> to vector<8x128xf32>
    %57 = arith.mulf %54, %56 : vector<8x128xf32>
    %c5 = arith.constant 5 : index
    %c0_19 = arith.constant 0 : index
    %58 = vector.load %arg5[%c5, %c0_19] : memref<8x128xf32, #tpu.memory_space<vmem>>, vector<1x128xf32>
    %59 = vector.broadcast %58 : vector<1x128xf32> to vector<8x128xf32>
    %60 = arith.addf %57, %59 : vector<8x128xf32>
    %61 = arith.addf %53, %60 : vector<8x128xf32>
    %c0_20 = arith.constant 0 : index
    %c0_21 = arith.constant 0 : index
    %c0_22 = arith.constant 0 : index
    %62 = vector.load %arg6[%c0_20, %c0_21, %c0_22] : memref<1x8x128xf32, #tpu.memory_space<vmem>>, vector<1x8x128xf32>
    %63 = vector.shape_cast %62 : vector<1x8x128xf32> to vector<8x128xf32>
    %64 = vector.shape_cast %61 : vector<8x128xf32> to vector<1x8x128xf32>
    tpu.vector_store %arg6[%c0_20, %c0_21, %c0_22], %64 {strides = array<i32>} : memref<1x8x128xf32, #tpu.memory_space<vmem>>, vector<1x8x128xf32>,
    return
  }
  func.func @transform_0(%arg0: i32, %arg1: i32) -> (i32, i32, i32, i32) {
    %c0_i32 = arith.constant 0 : i32
    %c0_i32_0 = arith.constant 0 : i32
    %c0_i32_1 = arith.constant 0 : i32
    return %arg0, %arg1, %c0_i32, %c0_i32_0 : i32, i32, i32, i32
  }
  func.func @transform_1(%arg0: i32, %arg1: i32) -> (i32, i32) {
    %c0_i32 = arith.constant 0 : i32
    %c0_i32_0 = arith.constant 0 : i32
    %c0_i32_1 = arith.constant 0 : i32
    return %c0_i32, %c0_i32_0 : i32, i32
  }
  func.func @transform_2(%arg0: i32, %arg1: i32) -> (i32, i32) {
    %c0_i32 = arith.constant 0 : i32
    %c0_i32_0 = arith.constant 0 : i32
    %c0_i32_1 = arith.constant 0 : i32
    return %c0_i32, %c0_i32_0 : i32, i32
  }
  func.func @transform_3(%arg0: i32, %arg1: i32) -> (i32, i32) {
    %c0_i32 = arith.constant 0 : i32
    %c0_i32_0 = arith.constant 0 : i32
    %c0_i32_1 = arith.constant 0 : i32
    return %c0_i32, %c0_i32_0 : i32, i32
  }
  func.func @transform_4(%arg0: i32, %arg1: i32) -> (i32, i32, i32) {
    %c0_i32 = arith.constant 0 : i32
    %c0_i32_0 = arith.constant 0 : i32
    return %arg0, %arg1, %c0_i32 : i32, i32, i32
  }
}

</mosaic_0001>

<bundles_post_ra>
// kernel: tpu_custom_call.1
= control target key start
LH: loop header
LB: loop body
LE: loop exit
PB: predicated region body
PF: predicated region fallthrough
CT: control target
= control target key end

     0   :  { %9 = vsyncpa [#allocation3], 0  ;;  %s1444_s0 = inlined_call_operand.vmem [shape: f32[2,2,12,4], index: 0, kind: input, shape index: {}]   ;;  %s1445_s1 = inlined_call_operand.vmem [shape: f32[12,256], index: 1, kind: input, shape index: {}]   ;;  %s1446_s2 = inlined_call_operand.hbm [shape: f32[384,128], index: 2, kind: input, shape index: {}]   ;;  %s1447_s3 = inlined_call_operand.vmem [shape: f32[8,128], index: 3, kind: input, shape index: {}]   ;;  %s1448_s4 = inlined_call_operand.hbm [shape: f32[2,16,128], index: 4, kind: output, shape index: {}]  }
   0x1   :  { %10 = vsyncpa [#allocation4], 0 }
   0x2   :  { %12 = vsyncpa [#allocation4 + $0x1], 0  ;;  %s1191_s15 = smov 0   ;;  %s1193_s16 = smov 0  }
   0x3   :  { %s1195_s17 = smov 0   ;;  %s1197_s18 = smov 0  }
   0x4   :  { %s1199_s19 = smov 0   ;;  %s1201_s20 = smov 0  }
   0x5   :  { %s1203_s21 = smov 0   ;;  %s1205_s22 = smov 0  }
   0x6 LB: > { %s758_s23 = sadd.s32 4294967295, %s1154_s22   ;;  %s759_s24 = sadd.s32 4294967294, %s1154_s22   ;;  %s1154_s22 = sphi %s1205_s22, %s18_s22   ;;  %s1150_s21 = sphi %s1203_s21, %s1472_s21   ;;  %s1146_s20 = sphi %s1201_s20, %s1471_s20   ;;  %s1142_s19 = sphi %s1199_s19, %s1470_s19   ;;  %s1138_s18 = sphi %s1197_s18, %s1469_s18   ;;  %s1134_s17 = sphi %s1195_s17, %s1468_s17   ;;  %s1130_s16 = sphi %s1193_s16, %s1467_s16   ;;  %s1126_s15 = sphi %s1191_s15, %s1466_s15  }
   0x7   : > { %s27_s25 = sadd.s32 1, %s1146_s20  ;;  %s30_s26 = sadd.s32 1, %s1150_s21 }
   0x8   : > { %p28_p0 = scmp.ge.s32.totalorder %s27_s25, 2  ;;  %s130_s27 = sadd.s32 1, %s1134_s17 }
   0x9   : > { %p140_p1 = scmp.ne.s32.totalorder %s1134_s17, %s1130_s16  ;;  %p141_p2 = scmp.eq.s32.totalorder %s758_s23, 3 }
   0xa   : > { %s1474_s25 = smov (%p28_p0, %s27_s25), 0  ;;  %s1476_s26 = smov (!%p28_p0, %s30_s26), %s1150_s21 }
   0xb   : > { %s126_s28 = ssub.s32 %s1146_s20, %s1474_s25  ;;  %p1243_p3 = por %p141_p2, %p140_p1 }
   0xc   : > { %p32_p4 = scmp.ge.s32.totalorder %s1476_s26, 2  ;;  %p146_p5 = scmp.ne.s32.totalorder %s1130_s16, %s1126_s15 }
   0xd   : > { %s1453_s29 = scalar_select %p1243_p3, 1, 0 }
   0xe   : > { %p147_p6 = scmp.eq.s32.totalorder %s759_s24, 3  ;;  %p760_p7 = scmp.ge.s32.totalorder %s1154_s22, 1 }
   0xf   : > { %s1478_s26 = smov (%p32_p4, %s1476_s26), 0  ;;  %p154_p9 = scmp.lt.s32.totalorder %s1154_s22, 5 }
  0x10   : > { %p1252_p8 = por %p147_p6, %p146_p5  ;;  %s125_s5 = ssub.s32 %s1150_s21, %s1478_s26 }
  0x11   : > { %s127_s6 = sor.u32 %s126_s28, %s125_s5  ;;  %p1259_p10 = pnand %p760_p7, %p154_p9 }
  0x12   : > { %s1454_s30 = scalar_select %p1252_p8, 1, 0 }
  0x13   : > { %s1455_s7 = scalar_select %p1259_p10, 1, 0 }
  0x14   : > { %p128_p11 = scmp.eq.s32.totalorder %s127_s6, 0  ;;  %p1263_p12 = scmp.eq.s32.totalorder %s758_s23, 0 }
  0x15   : > { %p944_p13 = pneg %p1259_p10  ;;  %s1156_s10 = smov [#allocation2]  }
  0x16   : > { %s1456_s8 = scalar_select %p1263_p12, 1, 0 }
  0x17   : > { %s1270_s9 = scalar_select %p128_p11, %s1134_s17, %s130_s27  }
  0x18   : > { %s169_s11 = sshll.u32 %s1156_s10, 4  ;;  %p1274_p0 = pnand %p1263_p12, %p944_p13  ;;  %s170_s11 = int_to_ptr.vmem [resolvable:$true] %s169_s11 }
  0x19   : > { %s1028_s23 = scalar_lea.hbm %s1446_s2, 6144 }
  0x1a   : > { %p1029_p1 = scmp.ne.s32.totalorder %s1446_s2, %s1028_s23  ;;  %p1030_p2 = pneg %p1274_p0 }
  0x1b   : > { %p1035_p6 = scmp.lt.u32.totalorder %s1028_s23, %s1446_s2 }
  0x1c   : > { %p1031_p4 = pnand %p1030_p2, %p1029_p1 }
  0x1e   : > { %p1032_p5 = pneg %p1031_p4 }
  0x20   : > { %p1037_p7 = pnand %p1035_p6, %p1032_p5 }
  0x22   : > { %1040 = shalt.err (!%p1037_p7)
}
  0x23   : > { %s1041_s6 = scalar_lea.vmem %s170_s11, 6144  ;;  %p1049_p8 = scmp.lt.s32.totalorder %s170_s11, %s170_s11 }
  0x24   : > { %p1042_p9 = scmp.ne.s32.totalorder %s170_s11, %s1041_s6  ;;  %p1050_p3 = scmp.lt.s32.totalorder %s1041_s6, %s1041_s6 }
  0x26   : > { %p1044_p11 = pnand %p1042_p9, %p1030_p2  ;;  %p1051_p12 = por %p1050_p3, %p1049_p8 }
  0x28   : > { %p1045_p13 = pneg %p1044_p11 }
  0x2a   : > { %p1052_p10 = pnand %p1051_p12, %p1045_p13 }
  0x2c   : > { %1055 = shalt.err (!%p1052_p10)
}
  0x2d   : > { %s1157_s10 = smov 128   ;;  %s1158_s13 = smov 8  }
  0x2e   : > { %947 = dma.hbm_to_vmem [thread:$0]  (!%p1274_p0), %s1446_s2, 6144, %s170_s11, [#allocation3], %s1157_s10, %s1157_s10, %s1158_s13  }
  0x2f   : > { %p1458_p1 = scmp.ne.s32.totalorder %s1455_s7, 0 }
  0x30   : > { %p1459_p4 = scmp.ne.s32.totalorder (!%p1458_p1), %s1456_s8, 0 }
  0x31   : > { %200 = sbr.rel (%p1458_p1) target bundleno = 658 (0x292), region = 36 }
  0x38   : > { %1117 = dma.done.wait (%p1459_p4), [#allocation3], 6144  }
  0x39   : > { %1119 = vsyncadd (%p1459_p4), [#allocation3], 4294961152  ;;  %p230_p3 = scmp.lt.s32.totalorder %s1142_s19, 1  ;;  %p232_p8 = scmp.lt.s32.totalorder %s1138_s18, 1  ;;  %vm280_vm0 = vcmask 1043456   ;;  %v1159_v0 = vmov 0.0  }
  0x3a   : > { %351 = vmatprep.mubr.f32.mxu0 %v1159_v0  ;;  %vm1160_vm1 = vmmov 1   ;;  %v270_v2 = vld [vmem:[%s1445_s1 + $0x8] sm:$0xff]  ;;  %v272_v3 = vld [vmem:[%s1445_s1 + $0x18] sm:$0xf]  ;;  %v269_v4 = vld [vmem:[%s1445_s1] sm:$0xff]  ;;  %vm243_vm3 = vcmask 1046528  }
  0x3b   : > { %s231_s12 = scalar_select %p230_p3, %s1142_s19, 1  ;;  %vm1305_vm2 = vmpackc.low %vm280_vm0, %vm1160_vm1  ;;  %v876_v5 = vpack.c.bf16 %v272_v3, %v270_v2  ;;  %v271_v6 = vld [vmem:[%s1445_s1 + $0x10] sm:$0xf]  ;;  %v435_v10 = vld [vmem:[#allocation2 + $0x80] sm:$0xff]  ;;  %vm253_vm4 = vcmask 1045504   ;;  %v1162_v20 = vmov 0.0|0.0  }
  0x3c   : > { %s233_s23 = scalar_select %p232_p8, %s1138_s18, 1  ;;  %v879_v9 = vpack.c.bf16 %v271_v6, %v269_v4  ;;  %v436_v15 = vld [vmem:[#allocation2 + $0x88] sm:$0xff]  ;;  %v419_v17 = vld [vmem:[#allocation2] sm:$0xff]  ;;  %v437_v21 = vld [vmem:[#allocation2 + $0x90] sm:$0xff]  ;;  %vm263_vm5 = vcmask 31744   ;;  %vm266_vm6 = vcmask 64512  }
  0x3d   : > { %s767_s28 = sshll.u32 %s231_s12, 2  ;;  %878 = vmatprep.subr.msk.bf16.mxu0 %vm1305_vm2, %v876_v5  ;;  %v882_v16 = vpack.c.bf16 %v436_v15, %v435_v10  ;;  %v420_v18 = vld [vmem:[#allocation2 + $0x8] sm:$0xff]  ;;  %v438_v22 = vld [vmem:[#allocation2 + $0x98] sm:$0xff]  ;;  %v421_v25 = vld [vmem:[#allocation2 + $0x10] sm:$0xff]  ;;  %vm273_vm7 = vcmask 97280   ;;  %vm1164_vm8 = vmmov 0  }
  0x3e   : > { %s766_s7 = sshll.u32 %s233_s23, 1  ;;  %881 = vmatpush1.bf16.msk.msra.mxu0 %vm1305_vm2, %v879_v9  ;;  %v884_v23 = vpack.c.bf16 %v420_v18, %v419_v17  ;;  %v886_v24 = vpack.c.bf16 %v438_v22, %v437_v21  ;;  %v422_v26 = vld [vmem:[#allocation2 + $0x18] sm:$0xff]  ;;  %v439_v28 = vld [vmem:[#allocation2 + $0xa0] sm:$0xff]  ;;  %v440_v29 = vld [vmem:[#allocation2 + $0xa8] sm:$0xff]  ;;  %s776_s27 = sshll.u32 %s1138_s18, 3 }
  0x3f   : > { %s236_s11 = sadd.s32 %s767_s28, %s766_s7  ;;  %914 = vmatprep.subr.bf16.mxu0 %v1162_v20  ;;  %883 = vmatprep.subr.bf16.mxu1 %v882_v16  ;;  %v888_v30 = vpack.c.bf16 %v422_v26, %v421_v25  ;;  %v890_v31 = vpack.c.bf16 %v440_v29, %v439_v28  ;;  %v423_v32 = vld [vmem:[#allocation2 + $0x20] sm:$0xff]  ;;  %v424_v33 = vld [vmem:[#allocation2 + $0x28] sm:$0xff]  ;;  %v441_v34 = vld [vmem:[#allocation2 + $0xb0] sm:$0xff]  ;;  %s777_s5 = sadd.s32 4294967295, %s776_s27 }
  0x40   : > { %s768_s8 = sshll.u32 %s236_s11, 3  ;;  %s1161_s11 = smov 4   ;;  %885 = vmatpush3.bf16.msra.mxu1 %v884_v23  ;;  %v442_v35 = vld [vmem:[#allocation2 + $0xb8] sm:$0xff]  ;;  %v892_v36 = vpack.c.bf16 %v424_v33, %v423_v32  ;;  %v425_v38 = vld [vmem:[#allocation2 + $0x30] sm:$0xff]  ;;  %v451_v43 = vld [vmem:[#allocation2 + $0x100] sm:$0xff] }
  0x41   : > { %s238_s23 = scalar_lea.vmem %s1444_s0, %s768_s8  ;;  %s1163_s8 = smov 8   ;;  %887 = vmatprep.subr.bf16.mxu1 %v886_v24  ;;  %v894_v37 = vpack.c.bf16 %v442_v35, %v441_v34  ;;  %v426_v39 = vld [vmem:[#allocation2 + $0x38] sm:$0xff]  ;;  %v452_v44 = vld [vmem:[#allocation2 + $0x108] sm:$0xff]  ;;  %v453_v48 = vld [vmem:[#allocation2 + $0x110] sm:$0xff]  ;;  %v389_v35 = vlaneseq }
  0x42   : > { %v239_v7 = vld [vmem:[%s238_s23] sm:$0xff]  ;;  %v1324_v8 = vld [vmem:[%s238_s23 + $0x8] sm:$0xf]  ;;  %v896_v40 = vpack.c.bf16 %v426_v39, %v425_v38  ;;  %v915_v45 = vpack.c.bf16 %v452_v44, %v451_v43  ;;  %v454_v49 = vld [vmem:[#allocation2 + $0x118] sm:$0xff]  ;;  %s785_s10 = sshll.u32 %s1142_s19, 1  ;;  %p1464_p12 = scmp.ne.s32.totalorder %s1453_s29, 0 }
  0x43   : > { %v244_v11 = vrot.slane %v239_v7, 1  ;;  %v245_v12 = vrot.slane %v1324_v8, 1  ;;  %v254_v13 = vrot.slane %v239_v7, 2  ;;  %v255_v14 = vrot.slane %v1324_v8, 2  ;;  %v455_v54 = vld [vmem:[#allocation2 + $0x120] sm:$0xff]  ;;  %v456_v55 = vld [vmem:[#allocation2 + $0x128] sm:$0xff]  ;;  %s661_s23 = sadd.s32 %s1138_s18, %s785_s10 }
  0x44   : > { %889 = vmatpush3.bf16.msra.mxu1 %v888_v30  ;;  %v918_v53 = vpack.c.bf16 %v454_v49, %v453_v48  ;;  %v921_v57 = vpack.c.bf16 %v456_v55, %v455_v54  ;;  %v457_v58 = vld [vmem:[#allocation2 + $0x130] sm:$0xff]  ;;  %v458_v59 = vld [vmem:[#allocation2 + $0x138] sm:$0xff]  ;;  %v443_v61 = vld [vmem:[#allocation2 + $0xc0] sm:$0xff]  ;;  %s786_s28 = sshll.u32 %s661_s23, 7 }
  0x45   : > { %v246_v19 = vsel %vm243_vm3, %v244_v11, %v245_v12  ;;  %249 = vrot.lane.b32.xlu1 %v245_v12, %s1161_s11  ;;  %v256_v27 = vsel %vm253_vm4, %v254_v13, %v255_v14  ;;  %891 = vmatprep.subr.bf16.mxu1 %v890_v31  ;;  %v924_v60 = vpack.c.bf16 %v458_v59, %v457_v58  ;;  %v444_v62 = vld [vmem:[#allocation2 + $0xc8] sm:$0xff]  ;;  %v459_v63 = vld [vmem:[#allocation2 + $0x140] sm:$0xff]  ;;  %v461_v9 = vld [vmem:[#allocation2 + $0x150] sm:$0xff] }
  0x46   : > { %247 = vrot.lane.b32.xlu0 %v246_v19, %s1161_s11  ;;  %v898_v1 = vpack.c.bf16 %v444_v62, %v443_v61  ;;  %v460_v2 = vld [vmem:[#allocation2 + $0x148] sm:$0xff]  ;;  %v427_v3 = vld [vmem:[#allocation2 + $0x40] sm:$0xff]  ;;  %v462_v11 = vld [vmem:[#allocation2 + $0x158] sm:$0xff] }
  0x47   : > { %v428_v4 = vld [vmem:[#allocation2 + $0x48] sm:$0xff]  ;;  %v927_v5 = vpack.c.bf16 %v460_v2, %v459_v63  ;;  %v429_v12 = vld [vmem:[#allocation2 + $0x50] sm:$0xff]  ;;  %v930_v13 = vpack.c.bf16 %v462_v11, %v461_v9  ;;  %v447_v16 = vld [vmem:[#allocation2 + $0xe0] sm:$0xff] }
  0x48   : > { %893 = vmatpush3.bf16.msra.mxu1 %v892_v36  ;;  %v900_v6 = vpack.c.bf16 %v428_v4, %v427_v3  ;;  %v448_v17 = vld [vmem:[#allocation2 + $0xe8] sm:$0xff]  ;;  %v463_v18 = vld [vmem:[#allocation2 + $0x160] sm:$0xff]  ;;  %v449_v26 = vld [vmem:[#allocation2 + $0xf0] sm:$0xff]  ;;  %v390_v36 = vshrl.u32 %v389_v35, 7 }
  0x49   : > { %259 = vrot.lane.b32.xlu1 %v255_v14, %s1163_s8  ;;  %895 = vmatprep.subr.bf16.mxu1 %v894_v37  ;;  %v430_v14 = vld [vmem:[#allocation2 + $0x58] sm:$0xff]  ;;  %v906_v19 = vpack.c.bf16 %v448_v17, %v447_v16  ;;  %v464_v21 = vld [vmem:[#allocation2 + $0x168] sm:$0xff]  ;;  %v431_v22 = vld [vmem:[#allocation2 + $0x60] sm:$0xff]  ;;  %v394_v37 = vstv %s777_s5  ;;  %s1391_s5 = scalar_lea.hbm %s1448_s4, %s786_s28 }
  0x4a   : > { %257 = vrot.lane.b32.xlu0 %v256_v27, %s1163_s8  ;;  %v904_v15 = vpack.c.bf16 %v430_v14, %v429_v12  ;;  %v432_v23 = vld [vmem:[#allocation2 + $0x68] sm:$0xff]  ;;  %v933_v24 = vpack.c.bf16 %v464_v21, %v463_v18  ;;  %v450_v27 = vld [vmem:[#allocation2 + $0xf8] sm:$0xff]  ;;  %v465_v28 = vld [vmem:[#allocation2 + $0x170] sm:$0xff]  ;;  %v391_v38 = vadd.s32 8, %v390_v36  ;;  %s227_s8 = sand.u32 1, %s1130_s16  }
  0x4b   : > { %v908_v25 = vpack.c.bf16 %v432_v23, %v431_v22  ;;  %v910_v29 = vpack.c.bf16 %v450_v27, %v449_v26  ;;  %v466_v30 = vld [vmem:[#allocation2 + $0x178] sm:$0xff]  ;;  %v433_v31 = vld [vmem:[#allocation2 + $0x70] sm:$0xff]  ;;  %v782_v39 = vld [vmem:[%s1447_s3 + $0x4] ss:$0 sm:$0xff]  ;;  %s765_s6 = sshll.u32 %s227_s8, 3  ;;  %s650_s18 = scalar_lea.sflag [#allocation4], %s227_s8 }
  0x4c   : > { %897 = vmatpush3.bf16.msra.mxu1 %v896_v40  ;;  %v434_v32 = vld [vmem:[#allocation2 + $0x78] sm:$0xff]  ;;  %v936_v33 = vpack.c.bf16 %v466_v30, %v465_v28  ;;  %v775_v44 = vld [vmem:[%s1447_s3 + $0x6] ss:$0 sm:$0xff]  ;;  %v783_v48 = vld [vmem:[%s1447_s3 + $0x5] ss:$0 sm:$0xff]  ;;  %s229_s7 = scalar_lea.vmem [#allocation5], %s765_s6 }
  0x4d   : > { %899 = vmatprep.subr.bf16.mxu1 %v898_v1  ;;  %v912_v34 = vpack.c.bf16 %v434_v32, %v433_v31  ;;  %v779_v14 = vld [vmem:[%s1447_s3 + $0x2] ss:$0 sm:$0xff]  ;;  %v780_v16 = vld [vmem:[%s1447_s3 + $0x3] ss:$0 sm:$0xff]  ;;  %v781_v18 = vld [vmem:[%s1447_s3 + $0x7] ss:$0 sm:$0xff] }
  0x4e   : > { %s665_s11 = sshll.u32 %s229_s7, 4  ;;  %s1165_s6 = smov [#allocation5]   ;;  %s1393_s11 = int_to_ptr.vmem [resolvable:$true] %s665_s11 }
  0x4f   : > { %s1056_s10 = scalar_lea.vmem %s1393_s11, 128  ;;  %s1060_s13 = sshll.u32 %s1165_s6, 4  ;;  %s1061_s13 = int_to_ptr.vmem [resolvable:$false] %s1060_s13 }
  0x50   : > { %901 = vmatpush3.bf16.msra.mxu1 %v900_v6  ;;  %p1057_p10 = scmp.ne.s32.totalorder %s1393_s11, %s1056_s10  ;;  %s1062_s14 = scalar_lea.vmem %s1061_s13, 256 }
  0x51   : > { %p1063_p5 = scmp.lt.s32.totalorder %s1393_s11, %s1061_s13  ;;  %p1064_p6 = scmp.lt.s32.totalorder %s1062_s14, %s1056_s10 }
  0x52   : > { %p1058_p0 = pnand %p1057_p10, %p1464_p12 }
  0x53   : > { %p1065_p7 = por %p1064_p6, %p1063_p5 }
  0x54   : > { %p1059_p2 = pneg %p1058_p0 }
  0x56   : > { %p1066_p9 = pnand %p1065_p7, %p1059_p2 }
  0xb7   : > { %v250_v42 = vpop.permute.xlu1 %249 }
  0xb8   : > { %v248_v41 = vpop.permute.xlu0 %247  ;;  %v265_v51 = vsel %vm263_vm5, %v1324_v8, %v250_v42  ;;  %v446_v8 = vld [vmem:[#allocation2 + $0xd8] sm:$0xff] }
  0xb9   : > { %v264_v46 = vsel %vm263_vm5, %v239_v7, %v248_v41  ;;  %v445_v7 = vld [vmem:[#allocation2 + $0xd0] sm:$0xff]  ;;  %v395_v41 = vadd.s32 %v394_v37, %v390_v36 }
  0xba   : > { %v902_v10 = vpack.c.bf16 %v446_v8, %v445_v7 }
  0xbb   : > { %v260_v52 = vpop.permute.xlu1 %259  ;;  %vm397_vm9 = vcmp.ge.s32.totalorder %v395_v41, 0  ;;  %vm399_vm10 = vcmp.lt.s32.totalorder %v395_v41, 16 }
  0xbc   : > { %v258_v47 = vpop.permute.xlu0 %257  ;;  %v268_v56 = vsel %vm266_vm6, %v265_v51, %v260_v52  ;;  %903 = vmatprep.subr.bf16.mxu1 %v902_v10  ;;  %vm1365_vm14 = vmand %vm397_vm9, %vm399_vm10 }
  0xbd   : > { %v267_v50 = vsel %vm266_vm6, %v264_v46, %v258_v47  ;;  %905 = vmatpush3.bf16.msra.mxu1 %v904_v15  ;;  %v396_v46 = vadd.s32 %v394_v37, %v391_v38 }
  0xbe   : > { %771 = vmatmul.mubr.msk.f32.vlgmr.msra.gmra.mrb[0].mxu0 %vm273_vm7, %v267_v50  ;;  %907 = vmatprep.subr.bf16.mxu1 %v906_v19 }
  0xbf   : > { %357 = vmatprep.mubr.f32.mxu0 %v1159_v0  ;;  %916 = vmatpush3.bf16.msra.mxu0 %v915_v45  ;;  %vm398_vm12 = vcmp.ge.s32.totalorder %v396_v46, 0  ;;  %vm400_vm13 = vcmp.lt.s32.totalorder %v396_v46, 16 }
  0xc0   : > { %917 = vmatprep.subr.bf16.mxu0 %v1162_v20  ;;  %vm402_vm0 = vmand %vm398_vm12, %vm400_vm13 }
  0xc1   : > { %909 = vmatpush3.bf16.msra.mxu1 %v908_v25 }
  0xc2   : > { %772 = vmatmul.mubr.msk.f32.gmra.mrb[2].mxu0 %vm273_vm7, %v268_v56  ;;  %911 = vmatprep.subr.bf16.mxu1 %v910_v29 }
  0xc3   : > { %919 = vmatpush3.bf16.msra.mxu0 %v918_v53  ;;  %873 = vmatprep.mubr.msk.f32.mxu0 %vm1164_vm8, %v1159_v0  ;;  %v774_v0 = vld [vmem:[%s1447_s3 + $0x1] ss:$0 sm:$0xff] }
  0xc4   : > { %920 = vmatprep.subr.bf16.mxu0 %v1162_v20 }
  0xc5   : > { %913 = vmatpush3.bf16.msra.mxu1 %v912_v34 }
  0xc7   : > { %922 = vmatpush3.bf16.msra.mxu0 %v921_v57 }
  0xc8   : > { %923 = vmatprep.subr.bf16.mxu0 %v1162_v20 }
  0xcb   : > { %925 = vmatpush3.bf16.msra.mxu0 %v924_v60 }
  0xcc   : > { %926 = vmatprep.subr.bf16.mxu0 %v1162_v20 }
  0xcf   : > { %928 = vmatpush3.bf16.msra.mxu0 %v927_v5 }
  0xd0   : > { %929 = vmatprep.subr.bf16.mxu0 %v1162_v20 }
  0xd3   : > { %931 = vmatpush3.bf16.msra.mxu0 %v930_v13 }
  0xd4   : > { %932 = vmatprep.subr.bf16.mxu0 %v1162_v20 }
  0xd7   : > { %934 = vmatpush3.bf16.msra.mxu0 %v933_v24 }
  0xd8   : > { %935 = vmatprep.subr.bf16.mxu0 %v1162_v20  ;;  %v773_v20 = vld [vmem:[%s1447_s3] ss:$0 sm:$0xff] }
  0xdb   : > { %937 = vmatpush3.bf16.msra.mxu0 %v936_v33 }
 0x191   : > { %v353_v40 = vpop.f32.mrb[0].mxu0 }
 0x192   : > { %v369_v42 = vmul.f32 %v773_v20, %v353_v40  ;;  %v355_v43 = vpop.f32.mrb[1].mxu0 }
 0x193   : > { %v632_v45 = vmul.f32 %v782_v39, %v355_v43 }
 0x194   : > { %v376_v47 = vadd.f32 %v774_v0, %v369_v42 }
 0x195   : > { %v359_v49 = vpop.f32.mrb[2].mxu0  ;;  %v639_v53 = vadd.f32 %v783_v48, %v632_v45 }
 0x196   : > { %vm378_vm11 = vcmp.ge.f32.partialorder %v376_v47, 0.0  ;;  %v385_v50 = vmul.f32 %v775_v44, %v376_v47  ;;  %v370_v51 = vmul.f32 %v773_v20, %v359_v49  ;;  %v361_v52 = vpop.f32.mrb[3].mxu0 }
 0x197   : > { %v633_v54 = vmul.f32 %v782_v39, %v361_v52  ;;  %v643_v60 = vrot.slane %v639_v53, 1 }
 0x198   : > { %v377_v55 = vadd.f32 %v774_v0, %v370_v51  ;;  %v387_v56 = vsel %vm378_vm11, %v376_v47, %v385_v50 }
 0x199   : > { %v640_v58 = vadd.f32 %v783_v48, %v633_v54  ;;  %v407_v62 = vsel %vm1365_vm14, %v387_v56, 0.0 }
 0x19a   : > { %vm379_vm15 = vcmp.ge.f32.partialorder %v377_v55, 0.0  ;;  %v386_v59 = vmul.f32 %v775_v44, %v377_v55  ;;  %v411_v3 = vrot.slane %v407_v62, 1  ;;  %v415_v5 = vrot.slane %v407_v62, 2 }
 0x19b   : > { %v644_v61 = vrot.slane %v640_v58, 1 }
 0x19c   : > { %v388_v63 = vsel %vm379_vm15, %v377_v55, %v386_v59 }
 0x19d   : > { %v645_v1 = vsel %vm243_vm3, %v643_v60, %v644_v61  ;;  %v408_v2 = vsel %vm402_vm0, %v388_v63, 0.0 }
 0x19e   : > { %v412_v4 = vrot.slane %v408_v2, 1  ;;  %v416_v6 = vrot.slane %v408_v2, 2 }
 0x1a0   : > { %v413_v7 = vsel %vm243_vm3, %v411_v3, %v412_v4  ;;  %v417_v8 = vsel %vm253_vm4, %v415_v5, %v416_v6 }
 0x1a1   : > { %531 = vmatprep.mubr.f32.mxu1 %v413_v7  ;;  %874 = vmatmul.mubr.f32.vlgmr.msra.gmra.mrb[4].mxu0 %v417_v8 }
 0x1a2   : > { %778 = vmatmul.mubr.msk.f32.vlgmr.msra.gmra.mrb[0].mxu1 %vm1365_vm14, %v387_v56 }
 0x274   : > { %v603_v9 = vpop.f32.mrb[4].mxu0 }
 0x275   : > { %v821_v10 = vpop.f32.mrb[0].mxu1  ;;  %v875_v11 = vpop.f32.mrb[5].mxu0 }
 0x276   : > { %v822_v12 = vpop.f32.mrb[1].mxu1 }
 0x277   : > { %v823_v13 = vadd.f32 %v822_v12, %v821_v10 }
 0x279   : > { %v604_v15 = vadd.f32 %v823_v13, %v603_v9 }
 0x27b   : > { %v612_v17 = vmul.f32 %v779_v14, %v604_v15 }
 0x27d   : > { %v618_v19 = vadd.f32 %v780_v16, %v612_v17 }
 0x27f   : > { %vm619_vm1 = vcmp.ge.f32.partialorder %v618_v19, 0.0  ;;  %v625_v21 = vmul.f32 %v781_v18, %v618_v19 }
 0x281   : > { %v626_v22 = vsel %vm619_vm1, %v618_v19, %v625_v21 }
 0x282   : > { %v647_v23 = vadd.f32 %v645_v1, %v626_v22 }
 0x284   : > { %648 = vst [vmem:[%s229_s7] sm:$0xff] %v647_v23 }
 0x285   : > { %1069 = shalt.err (!%p1066_p9)
}
 0x286   : > { %s1070_s8 = scalar_lea.hbm %s1391_s5, 128  ;;  %s1074_s23 = scalar_lea.hbm %s1448_s4, 512 }
 0x287   : > { %p1071_p11 = scmp.ne.s32.totalorder %s1391_s5, %s1070_s8  ;;  %p1075_p4 = scmp.lt.u32.totalorder %s1391_s5, %s1448_s4 }
 0x288   : > { %p1076_p3 = scmp.lt.u32.totalorder %s1074_s23, %s1070_s8  ;;  %p1078_p10 = scmp.lt.u32.totalorder %s1070_s8, %s1391_s5 }
 0x289   : > { %p1072_p13 = pnand %p1071_p11, %p1464_p12 }
 0x28a   : > { %p1077_p8 = por %p1076_p3, %p1075_p4 }
 0x28b   : > { %p1073_p1 = pneg %p1072_p13 }
 0x28c   : > { %p1079_p0 = por %p1078_p10, %p1077_p8 }
 0x28e   : > { %p1080_p2 = pnand %p1079_p0, %p1073_p1 }
 0x290   : > { %1083 = shalt.err (!%p1080_p2)
}
 0x291   : > { %942 = dma.vmem_to_hbm [thread:$0]  (%p1464_p12), %s1393_s11, 128, %s1391_s5, %s650_s18  }
 0x292 PF: > { %p954_p5 = scmp.ge.s32.totalorder %s1154_s22, 2  ;;  %s677_s19 = sand.u32 1, %s1126_s15  }
 0x293   : > { %p1465_p6 = scmp.ne.s32.totalorder %s1454_s30, 0  ;;  %s678_s27 = scalar_lea.sflag [#allocation4], %s677_s19 }
 0x295   : > { %p949_p7 = pnand %p954_p5, %p1465_p6 }
 0x297   : > { %1121 = dma.done.wait (!%p949_p7), %s678_s27, 128  }
 0x298   : > { %1123 = vsyncadd (!%p949_p7), %s678_s27, 4294967168  ;;  %s18_s22 = sadd.s32 1, %s1154_s22   ;;  %s1466_s15 = smov %s1130_s16 }
 0x299   : > { %p15_p9 = scmp.ge.s32.totalorder %s18_s22, 6   ;;  %s1467_s16 = smov %s1134_s17 }
 0x29a   : > { %s1468_s17 = smov %s1270_s9  ;;  %s1469_s18 = smov %s1146_s20 }
 0x29b   : > { %s1470_s19 = smov %s1150_s21  ;;  %s1471_s20 = smov %s1474_s25 }
 0x29c   : > { %s1472_s21 = smov %s1478_s26  ;;  %17 = sbr.rel (!%p15_p9) target bundleno = 6 (0x6), region = 76 }
 0x2a3   :  { %683 = vsyncpa [#allocation3], 1 }
 0x2a4   :  { %685 = vsyncpa [#allocation3 + $0x1], 1 }
 0x2a5   :  { %686 = vsyncpa [#allocation4], 1 }
 0x2a6   :  { %688 = vsyncpa [#allocation4 + $0x1], 1 }

</bundles_post_ra>
